<compile_context>
chip_gen: v6e
topology: v6e:2x2x1
jax: 0.10.0
libtpu: 0.0.40
codegen_flags: <defaults>
</compile_context>

<pallas_src>
import jax
import jax.numpy as jnp
import numpy as np
from jax.experimental import pallas as pl
from jax.experimental.pallas import tpu as pltpu

EPS = 1e-5
MATMUL_DTYPE = jnp.bfloat16   # MXU operand dtype (accumulation is always f32)


def _banded_conv_weights(w_oihw, W):
    """Fold the 3 kx taps of a 3x3 conv into per-ky banded matrices.

    Returns B of shape (3, W*Cin, W*Cout) such that, with the ky-shifted
    activation slab  x_ky[(n,h), wi*Cin+ci] = x[n, h+ky-1, wi, ci]  (zero
    padded in h), the conv output is   sum_ky  x_ky @ B[ky].
    W-direction zero padding is implicit in the band structure.
    """
    Cout, Cin, KH, KW = w_oihw.shape
    w = np.asarray(w_oihw, np.float32)
    B = np.zeros((KH, W * Cin, W * Cout), np.float32)
    for ky in range(KH):
        for kx in range(KW):
            blk = w[:, :, ky, kx].T                      # (Cin, Cout)
            for wo in range(W):
                wi = wo + kx - 1
                if 0 <= wi < W:
                    B[ky, wi * Cin:(wi + 1) * Cin,
                      wo * Cout:(wo + 1) * Cout] = blk
    return B


def _make_kernel(N, H, W, C):
    NH, WC = N * H, W * C
    inv_count = 1.0 / float(N * H * W)

    def kernel(x_ref, w1_ref, w2_ref, g1_ref, b1_ref, g2_ref, b2_ref, out_ref):
        # Static per-row masks for the +/-1 row (ky) shifts (zero fill at the
        # top / bottom row of each image).  Computed once, reused by both convs.
        row = jax.lax.broadcasted_iota(jnp.int32, (NH, WC), 0)
        has_above = (row % H) != 0          # row h-1 exists within the image
        has_below = (row % H) != (H - 1)    # row h+1 exists within the image

        def conv3x3(v, w_ref):
            # ky shifts: XLU sublane rolls + boundary masks (no MXU work).
            up = jnp.where(has_above, pltpu.roll(v, 1, axis=0), 0.0)       # row h-1
            dn = jnp.where(has_below, pltpu.roll(v, NH - 1, axis=0), 0.0)  # row h+1
            # kx taps are folded into the banded per-ky weights, so the conv is
            # three K=WC bf16 MXU matmuls accumulated in f32.
            acc = jnp.dot(up.astype(MATMUL_DTYPE), w_ref[0],
                          preferred_element_type=jnp.float32)
            acc = acc + jnp.dot(v.astype(MATMUL_DTYPE), w_ref[1],
                                preferred_element_type=jnp.float32)
            acc = acc + jnp.dot(dn.astype(MATMUL_DTYPE), w_ref[2],
                                preferred_element_type=jnp.float32)
            return acc

        def channel_mean(v):
            # Per-channel mean over (N, H, W): all-reduce across the W width
            # groups in the lane dim (lane rolls + adds, f32, off the MXU),
            # then a sublane sum.  Result (1, WC) holds the per-channel mean
            # replicated across width groups -- already in broadcast layout.
            s = v
            if W & (W - 1) == 0:            # power-of-two W: log tree
                sh = C
                while sh < WC:
                    s = s + pltpu.roll(s, sh, axis=1)
                    sh *= 2
            else:                           # general W: ring accumulate
                for _ in range(W - 1):
                    s = v + pltpu.roll(s, C, axis=1)
            return jnp.sum(s, axis=0, keepdims=True) * inv_count

        def bn(y, g_ref, b_ref):
            # Training-mode (biased) batch stats, two-pass variance; affine
            # folded into one scale/shift (one mul + one add apply), all f32.
            mean = channel_mean(y)
            d = y - mean
            var = channel_mean(d * d)
            scale = g_ref[...] * jax.lax.rsqrt(var + EPS)    # (1, WC)
            shift = b_ref[...] - mean * scale                # (1, WC)
            return y * scale + shift

        x = x_ref[...]                                       # (N*H, W*C) f32
        y1 = jnp.maximum(bn(conv3x3(x, w1_ref), g1_ref, b1_ref), 0.0)
        y2 = bn(conv3x3(y1, w2_ref), g2_ref, b2_ref)
        out_ref[...] = jnp.maximum(y2 + x, 0.0)              # residual + relu

    return kernel


def basic_block_slab(x_slab, w1b, w2b, g1t, b1t, g2t, b2t, N, H, W, C):
    """Lane-dense entry point: x_slab is (N*H, W*C) f32; keeps chained blocks
    in slab layout (no NCHW transposes / HBM round-trips between blocks)."""
    NH, WC = N * H, W * C
    full2 = lambda i: (0, 0)
    full3 = lambda i: (0, 0, 0)
    # NOTE: grid=(1,) -> default double-buffering is harmless at this size;
    # make buffering explicit (pl.Buffered) before scaling block sizes.
    return pl.pallas_call(
        _make_kernel(N, H, W, C),
        out_shape=jax.ShapeDtypeStruct((NH, WC), jnp.float32),
        grid_spec=pltpu.PrefetchScalarGridSpec(
            num_scalar_prefetch=0,
            grid=(1,),
            in_specs=[
                pl.BlockSpec((NH, WC), full2),         # activation slab (f32)
                pl.BlockSpec((3, WC, WC), full3),      # conv1 per-ky banded weights (bf16)
                pl.BlockSpec((3, WC, WC), full3),      # conv2 per-ky banded weights (bf16)
                pl.BlockSpec((1, WC), full2),          # gamma1 (width-tiled)
                pl.BlockSpec((1, WC), full2),          # beta1
                pl.BlockSpec((1, WC), full2),          # gamma2
                pl.BlockSpec((1, WC), full2),          # beta2
            ],
            out_specs=pl.BlockSpec((NH, WC), full2),
        ),
        compiler_params=pltpu.CompilerParams(
            dimension_semantics=("arbitrary",)),
    )(x_slab, w1b, w2b, g1t, b1t, g2t, b2t)


def basic_block(x_nchw, w1_oihw, g1, b1, w2_oihw, g2, b2):
    """BasicBlock forward.  x_nchw: (N, C, H, W) f32; conv weights OIHW."""
    N, Cin, H, W = x_nchw.shape
    Cout = w1_oihw.shape[0]
    assert Cin == Cout, "stride=1, downsample=None requires inplanes == planes"
    C = Cin

    # lane-dense activation slab: row (n, h), column w*C + c
    x_slab = jnp.transpose(x_nchw, (0, 2, 3, 1)).reshape(N * H, W * C).astype(jnp.float32)

    # host-side weight packing (done once per model in practice)
    w1b = jnp.asarray(_banded_conv_weights(w1_oihw, W), MATMUL_DTYPE)   # (3, WC, WC)
    w2b = jnp.asarray(_banded_conv_weights(w2_oihw, W), MATMUL_DTYPE)
    tile = lambda v: jnp.tile(jnp.asarray(v, jnp.float32).reshape(1, C), (1, W))  # (1, WC)

    out_slab = basic_block_slab(x_slab, w1b, w2b,
                                tile(g1), tile(b1), tile(g2), tile(b2),
                                N, H, W, C)
    return jnp.transpose(out_slab.reshape(N, H, W, C), (0, 3, 1, 2))    # back to NCHW


def ref_basic_block(x, w1, g1, b1, w2, g2, b2, matmul_dtype=jnp.float32):
    """Pure-JAX reference (NCHW, PyTorch training-mode semantics).

    `matmul_dtype` mirrors the kernel's MXU operand rounding; with float32 it
    is the exact f32 reference of the PyTorch module.
    """
    rnd = lambda a: a.astype(matmul_dtype).astype(jnp.float32)

    def conv(x_, w_):
        return jax.lax.conv_general_dilated(
            rnd(x_), rnd(w_), window_strides=(1, 1), padding=((1, 1), (1, 1)),
            dimension_numbers=("NCHW", "OIHW", "NCHW"),
            precision=jax.lax.Precision.HIGHEST)

    def bn(y, g, b):
        mean = jnp.mean(y, axis=(0, 2, 3), keepdims=True)
        var = jnp.mean((y - mean) ** 2, axis=(0, 2, 3), keepdims=True)
        return ((y - mean) * jax.lax.rsqrt(var + EPS)
                * g.reshape(1, -1, 1, 1) + b.reshape(1, -1, 1, 1))

    out = jnp.maximum(bn(conv(x, w1), g1, b1), 0.0)
    out = bn(conv(out, w2), g2, b2) + x
    return jnp.maximum(out, 0.0)


if __name__ == "__main__":
    # Small shapes: batch=2, inplanes=planes=8, spatial=16x16  (W*C = 128 lanes).
    N, C, H, W = 2, 8, 16, 16
    key = jax.random.PRNGKey(0)
    kx, kw1, kw2, kg1, kb1, kg2, kb2 = jax.random.split(key, 7)

    x = jax.random.normal(kx, (N, C, H, W), jnp.float32)
    w1 = jax.random.normal(kw1, (C, C, 3, 3), jnp.float32) * 0.1   # OIHW
    w2 = jax.random.normal(kw2, (C, C, 3, 3), jnp.float32) * 0.1   # OIHW
    g1 = 1.0 + 0.1 * jax.random.normal(kg1, (C,), jnp.float32)
    b1 = 0.1 * jax.random.normal(kb1, (C,), jnp.float32)
    g2 = 1.0 + 0.1 * jax.random.normal(kg2, (C,), jnp.float32)
    b2 = 0.1 * jax.random.normal(kb2, (C,), jnp.float32)

    out = jax.block_until_ready(basic_block(x, w1, g1, b1, w2, g2, b2))

    # Reference with the same MXU operand rounding as the kernel (set
    # MATMUL_DTYPE = jnp.float32 above for a bit-for-bit f32 comparison).
    ref = jax.block_until_ready(
        ref_basic_block(x, w1, g1, b1, w2, g2, b2, matmul_dtype=MATMUL_DTYPE))
    np.testing.assert_allclose(np.asarray(out), np.asarray(ref),
                               rtol=5e-3, atol=5e-3)

    print("KERNEL_OK")
</pallas_src>

<mosaic_0001>
module attributes {stable_mosaic.version = 11 : i64} {
  func.func @kernel(%arg0: i32, %arg1: memref<32x128xf32, #tpu.memory_space<vmem>>, %arg2: memref<3x128x128xbf16, #tpu.memory_space<vmem>>, %arg3: memref<3x128x128xbf16, #tpu.memory_space<vmem>>, %arg4: memref<1x128xf32, #tpu.memory_space<vmem>>, %arg5: memref<1x128xf32, #tpu.memory_space<vmem>>, %arg6: memref<1x128xf32, #tpu.memory_space<vmem>>, %arg7: memref<1x128xf32, #tpu.memory_space<vmem>>, %arg8: memref<32x128xf32, #tpu.memory_space<vmem>>) attributes {dimension_semantics = [#tpu.dimension_semantics<arbitrary>], iteration_bounds = array<i64: 1>, scalar_prefetch = 0 : i64, scratch_operands = 0 : i64, tpu.core_type = #tpu.core_type<tc>, window_params = [{pipeline_mode = #tpu.pipeline_mode<synchronous>, transform_indices = @transform_0, window_bounds = array<i64: 32, 128>}, {pipeline_mode = #tpu.pipeline_mode<synchronous>, transform_indices = @transform_1, window_bounds = array<i64: 3, 128, 128>}, {pipeline_mode = #tpu.pipeline_mode<synchronous>, transform_indices = @transform_2, window_bounds = array<i64: 3, 128, 128>}, {pipeline_mode = #tpu.pipeline_mode<synchronous>, transform_indices = @transform_3, window_bounds = array<i64: 1, 128>}, {pipeline_mode = #tpu.pipeline_mode<synchronous>, transform_indices = @transform_4, window_bounds = array<i64: 1, 128>}, {pipeline_mode = #tpu.pipeline_mode<synchronous>, transform_indices = @transform_5, window_bounds = array<i64: 1, 128>}, {pipeline_mode = #tpu.pipeline_mode<synchronous>, transform_indices = @transform_6, window_bounds = array<i64: 1, 128>}, {pipeline_mode = #tpu.pipeline_mode<synchronous>, transform_indices = @transform_7, window_bounds = array<i64: 32, 128>}]} {
    %0 = tpu.iota {dimensions = array<i32: 0>} : vector<32x128xi32>
    %c16_i32 = arith.constant 16 : i32
    %c0_i32 = arith.constant 0 : i32
    %1 = arith.cmpi eq, %c16_i32, %c0_i32 : i32
    %c1_i32 = arith.constant 1 : i32
    %2 = arith.select %1, %c1_i32, %c16_i32 : i32
    %3 = vector.broadcast %2 : i32 to vector<32x128xi32>
    %4 = arith.remsi %0, %3 : vector<32x128xi32>
    %c0_i32_0 = arith.constant 0 : i32
    %5 = vector.broadcast %c0_i32_0 : i32 to vector<32x128xi32>
    %6 = arith.cmpi ne, %4, %5 : vector<32x128xi32>
    %c0_i32_1 = arith.constant 0 : i32
    %7 = vector.broadcast %c0_i32_1 : i32 to vector<32x128xi32>
    %8 = arith.cmpi slt, %4, %7 : vector<32x128xi32>
    %c0_i32_2 = arith.constant 0 : i32
    %9 = arith.cmpi slt, %2, %c0_i32_2 : i32
    %10 = vector.broadcast %9 : i1 to vector<32x128xi1>
    %11 = vector.broadcast %10 : vector<32x128xi1> to vector<32x128xi1>
    %12 = arith.xori %8, %11 : vector<32x128xi1>
    %13 = arith.andi %12, %6 : vector<32x128xi1>
    %14 = vector.broadcast %2 : i32 to vector<32x128xi32>
    %15 = arith.addi %4, %14 : vector<32x128xi32>
    %16 = arith.select %13, %15, %4 : vector<32x128xi1>, vector<32x128xi32>
    %c0_i32_3 = arith.constant 0 : i32
    %17 = vector.broadcast %c0_i32_3 : i32 to vector<32x128xi32>
    %18 = arith.cmpi ne, %16, %17 : vector<32x128xi32>
    %c16_i32_4 = arith.constant 16 : i32
    %c0_i32_5 = arith.constant 0 : i32
    %19 = arith.cmpi eq, %c16_i32_4, %c0_i32_5 : i32
    %c1_i32_6 = arith.constant 1 : i32
    %20 = arith.select %19, %c1_i32_6, %c16_i32_4 : i32
    %21 = vector.broadcast %20 : i32 to vector<32x128xi32>
    %22 = arith.remsi %0, %21 : vector<32x128xi32>
    %c0_i32_7 = arith.constant 0 : i32
    %23 = vector.broadcast %c0_i32_7 : i32 to vector<32x128xi32>
    %24 = arith.cmpi ne, %22, %23 : vector<32x128xi32>
    %c0_i32_8 = arith.constant 0 : i32
    %25 = vector.broadcast %c0_i32_8 : i32 to vector<32x128xi32>
    %26 = arith.cmpi slt, %22, %25 : vector<32x128xi32>
    %c0_i32_9 = arith.constant 0 : i32
    %27 = arith.cmpi slt, %20, %c0_i32_9 : i32
    %28 = vector.broadcast %27 : i1 to vector<32x128xi1>
    %29 = vector.broadcast %28 : vector<32x128xi1> to vector<32x128xi1>
    %30 = arith.xori %26, %29 : vector<32x128xi1>
    %31 = arith.andi %30, %24 : vector<32x128xi1>
    %32 = vector.broadcast %20 : i32 to vector<32x128xi32>
    %33 = arith.addi %22, %32 : vector<32x128xi32>
    %34 = arith.select %31, %33, %22 : vector<32x128xi1>, vector<32x128xi32>
    %c15_i32 = arith.constant 15 : i32
    %35 = vector.broadcast %c15_i32 : i32 to vector<32x128xi32>
    %36 = arith.cmpi ne, %34, %35 : vector<32x128xi32>
    %c0 = arith.constant 0 : index
    %c0_10 = arith.constant 0 : index
    %37 = vector.load %arg1[%c0, %c0_10] : memref<32x128xf32, #tpu.memory_space<vmem>>, vector<32x128xf32>
    %c1_i32_11 = arith.constant 1 : i32
    %38 = tpu.dynamic_rotate %37 by %c1_i32_11 dim 0 : vector<32x128xf32>, i32 -> vector<32x128xf32>
    %cst = arith.constant 0.000000e+00 : f32
    %39 = vector.broadcast %cst : f32 to vector<32x128xf32>
    %40 = arith.select %18, %38, %39 : vector<32x128xi1>, vector<32x128xf32>
    %c31_i32 = arith.constant 31 : i32
    %41 = tpu.dynamic_rotate %37 by %c31_i32 dim 0 : vector<32x128xf32>, i32 -> vector<32x128xf32>
    %cst_12 = arith.constant 0.000000e+00 : f32
    %42 = vector.broadcast %cst_12 : f32 to vector<32x128xf32>
    %43 = arith.select %36, %41, %42 : vector<32x128xi1>, vector<32x128xf32>
    %44 = arith.truncf %40 : vector<32x128xf32> to vector<32x128xbf16>
    %c0_13 = arith.constant 0 : index
    %c0_14 = arith.constant 0 : index
    %c0_15 = arith.constant 0 : index
    %45 = vector.load %arg2[%c0_13, %c0_14, %c0_15] : memref<3x128x128xbf16, #tpu.memory_space<vmem>>, vector<1x128x128xbf16>
    %46 = vector.shape_cast %45 : vector<1x128x128xbf16> to vector<128x128xbf16>
    %cst_16 = arith.constant dense<0.000000e+00> : vector<32x128xf32>
    %47 = tpu.matmul %44, %46, %cst_16 {dimension_numbers = #tpu.dot_dimension_numbers<[1], [0], [0], [1], [0, 0, 1, 1], [], []>} : vector<32x128xbf16>, vector<128x128xbf16>, vector<32x128xf32> -> vector<32x128xf32>
    %48 = arith.truncf %37 : vector<32x128xf32> to vector<32x128xbf16>
    %c1 = arith.constant 1 : index
    %c0_17 = arith.constant 0 : index
    %c0_18 = arith.constant 0 : index
    %49 = vector.load %arg2[%c1, %c0_17, %c0_18] : memref<3x128x128xbf16, #tpu.memory_space<vmem>>, vector<1x128x128xbf16>
    %50 = vector.shape_cast %49 : vector<1x128x128xbf16> to vector<128x128xbf16>
    %cst_19 = arith.constant dense<0.000000e+00> : vector<32x128xf32>
    %51 = tpu.matmul %48, %50, %cst_19 {dimension_numbers = #tpu.dot_dimension_numbers<[1], [0], [0], [1], [0, 0, 1, 1], [], []>} : vector<32x128xbf16>, vector<128x128xbf16>, vector<32x128xf32> -> vector<32x128xf32>
    %52 = arith.addf %47, %51 : vector<32x128xf32>
    %53 = arith.truncf %43 : vector<32x128xf32> to vector<32x128xbf16>
    %c2 = arith.constant 2 : index
    %c0_20 = arith.constant 0 : index
    %c0_21 = arith.constant 0 : index
    %54 = vector.load %arg2[%c2, %c0_20, %c0_21] : memref<3x128x128xbf16, #tpu.memory_space<vmem>>, vector<1x128x128xbf16>
    %55 = vector.shape_cast %54 : vector<1x128x128xbf16> to vector<128x128xbf16>
    %cst_22 = arith.constant dense<0.000000e+00> : vector<32x128xf32>
    %56 = tpu.matmul %53, %55, %cst_22 {dimension_numbers = #tpu.dot_dimension_numbers<[1], [0], [0], [1], [0, 0, 1, 1], [], []>} : vector<32x128xbf16>, vector<128x128xbf16>, vector<32x128xf32> -> vector<32x128xf32>
    %57 = arith.addf %52, %56 : vector<32x128xf32>
    %c8_i32 = arith.constant 8 : i32
    %58 = tpu.dynamic_rotate %57 by %c8_i32 dim 1 : vector<32x128xf32>, i32 -> vector<32x128xf32>
    %59 = arith.addf %57, %58 : vector<32x128xf32>
    %c16_i32_23 = arith.constant 16 : i32
    %60 = tpu.dynamic_rotate %59 by %c16_i32_23 dim 1 : vector<32x128xf32>, i32 -> vector<32x128xf32>
    %61 = arith.addf %59, %60 : vector<32x128xf32>
    %c32_i32 = arith.constant 32 : i32
    %62 = tpu.dynamic_rotate %61 by %c32_i32 dim 1 : vector<32x128xf32>, i32 -> vector<32x128xf32>
    %63 = arith.addf %61, %62 : vector<32x128xf32>
    %c64_i32 = arith.constant 64 : i32
    %64 = tpu.dynamic_rotate %63 by %c64_i32 dim 1 : vector<32x128xf32>, i32 -> vector<32x128xf32>
    %65 = arith.addf %63, %64 : vector<32x128xf32>
    %cst_24 = arith.constant dense<0.000000e+00> : vector<128xf32>
    %66 = vector.multi_reduction <add>, %65, %cst_24 [0] : vector<32x128xf32> to vector<128xf32>
    %67 = vector.shape_cast %66 : vector<128xf32> to vector<1x128xf32>
    %cst_25 = arith.constant 0.001953125 : f32
    %68 = vector.broadcast %cst_25 : f32 to vector<1x128xf32>
    %69 = arith.mulf %67, %68 : vector<1x128xf32>
    %70 = vector.broadcast %69 : vector<1x128xf32> to vector<32x128xf32>
    %71 = arith.subf %57, %70 : vector<32x128xf32>
    %72 = arith.mulf %71, %71 : vector<32x128xf32>
    %c8_i32_26 = arith.constant 8 : i32
    %73 = tpu.dynamic_rotate %72 by %c8_i32_26 dim 1 : vector<32x128xf32>, i32 -> vector<32x128xf32>
    %74 = arith.addf %72, %73 : vector<32x128xf32>
    %c16_i32_27 = arith.constant 16 : i32
    %75 = tpu.dynamic_rotate %74 by %c16_i32_27 dim 1 : vector<32x128xf32>, i32 -> vector<32x128xf32>
    %76 = arith.addf %74, %75 : vector<32x128xf32>
    %c32_i32_28 = arith.constant 32 : i32
    %77 = tpu.dynamic_rotate %76 by %c32_i32_28 dim 1 : vector<32x128xf32>, i32 -> vector<32x128xf32>
    %78 = arith.addf %76, %77 : vector<32x128xf32>
    %c64_i32_29 = arith.constant 64 : i32
    %79 = tpu.dynamic_rotate %78 by %c64_i32_29 dim 1 : vector<32x128xf32>, i32 -> vector<32x128xf32>
    %80 = arith.addf %78, %79 : vector<32x128xf32>
    %cst_30 = arith.constant dense<0.000000e+00> : vector<128xf32>
    %81 = vector.multi_reduction <add>, %80, %cst_30 [0] : vector<32x128xf32> to vector<128xf32>
    %82 = vector.shape_cast %81 : vector<128xf32> to vector<1x128xf32>
    %cst_31 = arith.constant 0.001953125 : f32
    %83 = vector.broadcast %cst_31 : f32 to vector<1x128xf32>
    %84 = arith.mulf %82, %83 : vector<1x128xf32>
    %c0_32 = arith.constant 0 : index
    %c0_33 = arith.constant 0 : index
    %85 = vector.load %arg4[%c0_32, %c0_33] : memref<1x128xf32, #tpu.memory_space<vmem>>, vector<1x128xf32>
    %cst_34 = arith.constant 9.99999974E-6 : f32
    %86 = vector.broadcast %cst_34 : f32 to vector<1x128xf32>
    %87 = arith.addf %84, %86 : vector<1x128xf32>
    %88 = math.rsqrt %87 : vector<1x128xf32>
    %89 = arith.mulf %85, %88 : vector<1x128xf32>
    %c0_35 = arith.constant 0 : index
    %c0_36 = arith.constant 0 : index
    %90 = vector.load %arg5[%c0_35, %c0_36] : memref<1x128xf32, #tpu.memory_space<vmem>>, vector<1x128xf32>
    %91 = arith.mulf %69, %89 : vector<1x128xf32>
    %92 = arith.subf %90, %91 : vector<1x128xf32>
    %93 = vector.broadcast %89 : vector<1x128xf32> to vector<32x128xf32>
    %94 = arith.mulf %57, %93 : vector<32x128xf32>
    %95 = vector.broadcast %92 : vector<1x128xf32> to vector<32x128xf32>
    %96 = arith.addf %94, %95 : vector<32x128xf32>
    %cst_37 = arith.constant 0.000000e+00 : f32
    %97 = vector.broadcast %cst_37 : f32 to vector<32x128xf32>
    %98 = arith.maximumf %96, %97 : vector<32x128xf32>
    %c1_i32_38 = arith.constant 1 : i32
    %99 = tpu.dynamic_rotate %98 by %c1_i32_38 dim 0 : vector<32x128xf32>, i32 -> vector<32x128xf32>
    %cst_39 = arith.constant 0.000000e+00 : f32
    %100 = vector.broadcast %cst_39 : f32 to vector<32x128xf32>
    %101 = arith.select %18, %99, %100 : vector<32x128xi1>, vector<32x128xf32>
    %c31_i32_40 = arith.constant 31 : i32
    %102 = tpu.dynamic_rotate %98 by %c31_i32_40 dim 0 : vector<32x128xf32>, i32 -> vector<32x128xf32>
    %cst_41 = arith.constant 0.000000e+00 : f32
    %103 = vector.broadcast %cst_41 : f32 to vector<32x128xf32>
    %104 = arith.select %36, %102, %103 : vector<32x128xi1>, vector<32x128xf32>
    %105 = arith.truncf %101 : vector<32x128xf32> to vector<32x128xbf16>
    %c0_42 = arith.constant 0 : index
    %c0_43 = arith.constant 0 : index
    %c0_44 = arith.constant 0 : index
    %106 = vector.load %arg3[%c0_42, %c0_43, %c0_44] : memref<3x128x128xbf16, #tpu.memory_space<vmem>>, vector<1x128x128xbf16>
    %107 = vector.shape_cast %106 : vector<1x128x128xbf16> to vector<128x128xbf16>
    %cst_45 = arith.constant dense<0.000000e+00> : vector<32x128xf32>
    %108 = tpu.matmul %105, %107, %cst_45 {dimension_numbers = #tpu.dot_dimension_numbers<[1], [0], [0], [1], [0, 0, 1, 1], [], []>} : vector<32x128xbf16>, vector<128x128xbf16>, vector<32x128xf32> -> vector<32x128xf32>
    %109 = arith.truncf %98 : vector<32x128xf32> to vector<32x128xbf16>
    %c1_46 = arith.constant 1 : index
    %c0_47 = arith.constant 0 : index
    %c0_48 = arith.constant 0 : index
    %110 = vector.load %arg3[%c1_46, %c0_47, %c0_48] : memref<3x128x128xbf16, #tpu.memory_space<vmem>>, vector<1x128x128xbf16>
    %111 = vector.shape_cast %110 : vector<1x128x128xbf16> to vector<128x128xbf16>
    %cst_49 = arith.constant dense<0.000000e+00> : vector<32x128xf32>
    %112 = tpu.matmul %109, %111, %cst_49 {dimension_numbers = #tpu.dot_dimension_numbers<[1], [0], [0], [1], [0, 0, 1, 1], [], []>} : vector<32x128xbf16>, vector<128x128xbf16>, vector<32x128xf32> -> vector<32x128xf32>
    %113 = arith.addf %108, %112 : vector<32x128xf32>
    %114 = arith.truncf %104 : vector<32x128xf32> to vector<32x128xbf16>
    %c2_50 = arith.constant 2 : index
    %c0_51 = arith.constant 0 : index
    %c0_52 = arith.constant 0 : index
    %115 = vector.load %arg3[%c2_50, %c0_51, %c0_52] : memref<3x128x128xbf16, #tpu.memory_space<vmem>>, vector<1x128x128xbf16>
    %116 = vector.shape_cast %115 : vector<1x128x128xbf16> to vector<128x128xbf16>
    %cst_53 = arith.constant dense<0.000000e+00> : vector<32x128xf32>
    %117 = tpu.matmul %114, %116, %cst_53 {dimension_numbers = #tpu.dot_dimension_numbers<[1], [0], [0], [1], [0, 0, 1, 1], [], []>} : vector<32x128xbf16>, vector<128x128xbf16>, vector<32x128xf32> -> vector<32x128xf32>
    %118 = arith.addf %113, %117 : vector<32x128xf32>
    %c8_i32_54 = arith.constant 8 : i32
    %119 = tpu.dynamic_rotate %118 by %c8_i32_54 dim 1 : vector<32x128xf32>, i32 -> vector<32x128xf32>
    %120 = arith.addf %118, %119 : vector<32x128xf32>
    %c16_i32_55 = arith.constant 16 : i32
    %121 = tpu.dynamic_rotate %120 by %c16_i32_55 dim 1 : vector<32x128xf32>, i32 -> vector<32x128xf32>
    %122 = arith.addf %120, %121 : vector<32x128xf32>
    %c32_i32_56 = arith.constant 32 : i32
    %123 = tpu.dynamic_rotate %122 by %c32_i32_56 dim 1 : vector<32x128xf32>, i32 -> vector<32x128xf32>
    %124 = arith.addf %122, %123 : vector<32x128xf32>
    %c64_i32_57 = arith.constant 64 : i32
    %125 = tpu.dynamic_rotate %124 by %c64_i32_57 dim 1 : vector<32x128xf32>, i32 -> vector<32x128xf32>
    %126 = arith.addf %124, %125 : vector<32x128xf32>
    %cst_58 = arith.constant dense<0.000000e+00> : vector<128xf32>
    %127 = vector.multi_reduction <add>, %126, %cst_58 [0] : vector<32x128xf32> to vector<128xf32>
    %128 = vector.shape_cast %127 : vector<128xf32> to vector<1x128xf32>
    %cst_59 = arith.constant 0.001953125 : f32
    %129 = vector.broadcast %cst_59 : f32 to vector<1x128xf32>
    %130 = arith.mulf %128, %129 : vector<1x128xf32>
    %131 = vector.broadcast %130 : vector<1x128xf32> to vector<32x128xf32>
    %132 = arith.subf %118, %131 : vector<32x128xf32>
    %133 = arith.mulf %132, %132 : vector<32x128xf32>
    %c8_i32_60 = arith.constant 8 : i32
    %134 = tpu.dynamic_rotate %133 by %c8_i32_60 dim 1 : vector<32x128xf32>, i32 -> vector<32x128xf32>
    %135 = arith.addf %133, %134 : vector<32x128xf32>
    %c16_i32_61 = arith.constant 16 : i32
    %136 = tpu.dynamic_rotate %135 by %c16_i32_61 dim 1 : vector<32x128xf32>, i32 -> vector<32x128xf32>
    %137 = arith.addf %135, %136 : vector<32x128xf32>
    %c32_i32_62 = arith.constant 32 : i32
    %138 = tpu.dynamic_rotate %137 by %c32_i32_62 dim 1 : vector<32x128xf32>, i32 -> vector<32x128xf32>
    %139 = arith.addf %137, %138 : vector<32x128xf32>
    %c64_i32_63 = arith.constant 64 : i32
    %140 = tpu.dynamic_rotate %139 by %c64_i32_63 dim 1 : vector<32x128xf32>, i32 -> vector<32x128xf32>
    %141 = arith.addf %139, %140 : vector<32x128xf32>
    %cst_64 = arith.constant dense<0.000000e+00> : vector<128xf32>
    %142 = vector.multi_reduction <add>, %141, %cst_64 [0] : vector<32x128xf32> to vector<128xf32>
    %143 = vector.shape_cast %142 : vector<128xf32> to vector<1x128xf32>
    %cst_65 = arith.constant 0.001953125 : f32
    %144 = vector.broadcast %cst_65 : f32 to vector<1x128xf32>
    %145 = arith.mulf %143, %144 : vector<1x128xf32>
    %c0_66 = arith.constant 0 : index
    %c0_67 = arith.constant 0 : index
    %146 = vector.load %arg6[%c0_66, %c0_67] : memref<1x128xf32, #tpu.memory_space<vmem>>, vector<1x128xf32>
    %cst_68 = arith.constant 9.99999974E-6 : f32
    %147 = vector.broadcast %cst_68 : f32 to vector<1x128xf32>
    %148 = arith.addf %145, %147 : vector<1x128xf32>
    %149 = math.rsqrt %148 : vector<1x128xf32>
    %150 = arith.mulf %146, %149 : vector<1x128xf32>
    %c0_69 = arith.constant 0 : index
    %c0_70 = arith.constant 0 : index
    %151 = vector.load %arg7[%c0_69, %c0_70] : memref<1x128xf32, #tpu.memory_space<vmem>>, vector<1x128xf32>
    %152 = arith.mulf %130, %150 : vector<1x128xf32>
    %153 = arith.subf %151, %152 : vector<1x128xf32>
    %154 = vector.broadcast %150 : vector<1x128xf32> to vector<32x128xf32>
    %155 = arith.mulf %118, %154 : vector<32x128xf32>
    %156 = vector.broadcast %153 : vector<1x128xf32> to vector<32x128xf32>
    %157 = arith.addf %155, %156 : vector<32x128xf32>
    %158 = arith.addf %157, %37 : vector<32x128xf32>
    %cst_71 = arith.constant 0.000000e+00 : f32
    %159 = vector.broadcast %cst_71 : f32 to vector<32x128xf32>
    %160 = arith.maximumf %158, %159 : vector<32x128xf32>
    %c0_72 = arith.constant 0 : index
    %c0_73 = arith.constant 0 : index
    %161 = vector.load %arg8[%c0_72, %c0_73] : memref<32x128xf32, #tpu.memory_space<vmem>>, vector<32x128xf32>
    tpu.vector_store %arg8[%c0_72, %c0_73], %160 {strides = array<i32>} : memref<32x128xf32, #tpu.memory_space<vmem>>, vector<32x128xf32>,
    return
  }
  func.func @transform_0(%arg0: i32) -> (i32, i32) {
    %c0_i32 = arith.constant 0 : i32
    %c0_i32_0 = arith.constant 0 : i32
    %c0_i32_1 = arith.constant 0 : i32
    return %c0_i32, %c0_i32_0 : i32, i32
  }
  func.func @transform_1(%arg0: i32) -> (i32, i32, i32) {
    %c0_i32 = arith.constant 0 : i32
    %c0_i32_0 = arith.constant 0 : i32
    %c0_i32_1 = arith.constant 0 : i32
    %c0_i32_2 = arith.constant 0 : i32
    return %c0_i32, %c0_i32_0, %c0_i32_1 : i32, i32, i32
  }
  func.func @transform_2(%arg0: i32) -> (i32, i32, i32) {
    %c0_i32 = arith.constant 0 : i32
    %c0_i32_0 = arith.constant 0 : i32
    %c0_i32_1 = arith.constant 0 : i32
    %c0_i32_2 = arith.constant 0 : i32
    return %c0_i32, %c0_i32_0, %c0_i32_1 : i32, i32, i32
  }
  func.func @transform_3(%arg0: i32) -> (i32, i32) {
    %c0_i32 = arith.constant 0 : i32
    %c0_i32_0 = arith.constant 0 : i32
    %c0_i32_1 = arith.constant 0 : i32
    return %c0_i32, %c0_i32_0 : i32, i32
  }
  func.func @transform_4(%arg0: i32) -> (i32, i32) {
    %c0_i32 = arith.constant 0 : i32
    %c0_i32_0 = arith.constant 0 : i32
    %c0_i32_1 = arith.constant 0 : i32
    return %c0_i32, %c0_i32_0 : i32, i32
  }
  func.func @transform_5(%arg0: i32) -> (i32, i32) {
    %c0_i32 = arith.constant 0 : i32
    %c0_i32_0 = arith.constant 0 : i32
    %c0_i32_1 = arith.constant 0 : i32
    return %c0_i32, %c0_i32_0 : i32, i32
  }
  func.func @transform_6(%arg0: i32) -> (i32, i32) {
    %c0_i32 = arith.constant 0 : i32
    %c0_i32_0 = arith.constant 0 : i32
    %c0_i32_1 = arith.constant 0 : i32
    return %c0_i32, %c0_i32_0 : i32, i32
  }
  func.func @transform_7(%arg0: i32) -> (i32, i32) {
    %c0_i32 = arith.constant 0 : i32
    %c0_i32_0 = arith.constant 0 : i32
    %c0_i32_1 = arith.constant 0 : i32
    return %c0_i32, %c0_i32_0 : i32, i32
  }
}

</mosaic_0001>

<bundles_post_ra>
// kernel: tpu_custom_call.1
= control target key start
LH: loop header
LB: loop body
LE: loop exit
PB: predicated region body
PF: predicated region fallthrough
CT: control target
= control target key end

     0   :  { %12 = vsyncpa [#allocation3], 0  ;;  %s1937_s0 = inlined_call_operand.hbm [shape: f32[32,128], index: 0, kind: input, shape index: {}]   ;;  %s1938_s1 = inlined_call_operand.hbm [shape: bf16[3,128,128], index: 1, kind: input, shape index: {}]   ;;  %s1939_s2 = inlined_call_operand.hbm [shape: bf16[3,128,128], index: 2, kind: input, shape index: {}]   ;;  %s1940_s3 = inlined_call_operand.vmem [shape: f32[1,128], index: 3, kind: input, shape index: {}]   ;;  %s1941_s4 = inlined_call_operand.vmem [shape: f32[1,128], index: 4, kind: input, shape index: {}]   ;;  %s1942_s5 = inlined_call_operand.vmem [shape: f32[1,128], index: 5, kind: input, shape index: {}]   ;;  %s1943_s6 = inlined_call_operand.vmem [shape: f32[1,128], index: 6, kind: input, shape index: {}]   ;;  %s1944_s7 = inlined_call_operand.hbm [shape: f32[32,128], index: 7, kind: output, shape index: {}]  }
   0x1   :  { %13 = vsyncpa [#allocation6], 0 }
   0x2   :  { %14 = vsyncpa [#allocation4], 0  ;;  %s1627_s24 = smov [#allocation5]  }
   0x3   :  { %s32_s25 = sshll.u32 %s1627_s24, 4  ;;  %s33_s25 = int_to_ptr.vmem [resolvable:$true] %s32_s25 }
   0x4   :  { %s1549_s26 = scalar_lea.vmem %s33_s25, 3072  ;;  %p1554_p1 = scmp.lt.s32.totalorder %s33_s25, %s33_s25 }
   0x5   :  { %p1550_p0 = scmp.ne.s32.totalorder %s33_s25, %s1549_s26  ;;  %p1555_p2 = scmp.lt.s32.totalorder %s1549_s26, %s1549_s26 }
   0x7   :  { %p1556_p3 = por %p1555_p2, %p1554_p1 }
   0x9   :  { %p1557_p4 = pnand %p1556_p3, %p1550_p0 }
   0xb   :  { %1560 = shalt.err (!%p1557_p4)
}
   0xc   :  { %s1628_s27 = smov 64   ;;  %s1629_s28 = smov 4  }
   0xd   :  { %38 = dma.hbm_to_vmem [thread:$0]  %s1938_s1, 3072, %s33_s25, [#allocation6], %s1628_s27, %s1628_s27, %s1629_s28  }
   0xe   :  { %s1630_s8 = smov [#allocation2]  }
   0xf   :  { %s20_s9 = sshll.u32 %s1630_s8, 4  ;;  %s21_s9 = int_to_ptr.vmem [resolvable:$true] %s20_s9 }
  0x10   :  { %s1569_s10 = scalar_lea.vmem %s21_s9, 512  ;;  %p1574_p6 = scmp.lt.s32.totalorder %s21_s9, %s21_s9 }
  0x11   :  { %p1570_p5 = scmp.ne.s32.totalorder %s21_s9, %s1569_s10  ;;  %p1575_p7 = scmp.lt.s32.totalorder %s1569_s10, %s1569_s10 }
  0x13   :  { %p1576_p8 = por %p1575_p7, %p1574_p6 }
  0x15   :  { %p1577_p9 = pnand %p1576_p8, %p1570_p5 }
  0x17   :  { %1580 = shalt.err (!%p1577_p9)
}
  0x18   :  { %s1631_s11 = smov 128   ;;  %s1632_s12 = smov 8  }
  0x19   :  { %26 = dma.hbm_to_vmem [thread:$0]  %s1937_s0, 512, %s21_s9, [#allocation3], %s1631_s11, %s1631_s11, %s1632_s12  }
  0x1a   :  { %s1633_s1 = smov [#allocation7]  }
  0x1b   :  { %s44_s15 = sshll.u32 %s1633_s1, 4  ;;  %s45_s15 = int_to_ptr.vmem [resolvable:$true] %s44_s15 }
  0x1c   :  { %s1589_s16 = scalar_lea.vmem %s45_s15, 3072  ;;  %p1594_p11 = scmp.lt.s32.totalorder %s45_s15, %s45_s15 }
  0x1d   :  { %p1590_p10 = scmp.ne.s32.totalorder %s45_s15, %s1589_s16  ;;  %p1595_p12 = scmp.lt.s32.totalorder %s1589_s16, %s1589_s16 }
  0x1f   :  { %p1596_p13 = por %p1595_p12, %p1594_p11 }
  0x21   :  { %p1597_p0 = pnand %p1596_p13, %p1590_p10 }
  0x23   :  { %1600 = shalt.err (!%p1597_p0)
}
  0x24   :  { %50 = dma.hbm_to_vmem [thread:$0]  %s1939_s2, 3072, %s45_s15, [#allocation6], %s1628_s27, %s1628_s27, %s1629_s28  }
  0x25   :  { %1621 = dma.done.wait [#allocation3], 512  }
  0x26   :  { %1622 = vsyncadd [#allocation3], 4294966784 }
  0x27   :  { %1623 = dma.done.wait [#allocation6], 6144  }
  0x28   :  { %1624 = vsyncadd [#allocation6], 4294961152  ;;  %v1485_v0 = vld [vmem:[#allocation5 + $0x78] sm:$0xff]   ;;  %v1487_v2 = vld [vmem:[#allocation5 + $0x70] sm:$0xff]   ;;  %v69_v6 = vlaneseq  ;;  %vm1634_vm2 = vmmov 1   ;;  %s1635_s0 = smov 16  }
  0x29   :  { %v1486_v1 = vld [vmem:[#allocation5 + $0x38] sm:$0xff]   ;;  %1354 = vmatprep.subr.bf16.mxu0 %v1485_v0  ;;  %v1488_v3 = vld [vmem:[#allocation5 + $0x30] sm:$0xff]   ;;  %v1489_v4 = vld [vmem:[#allocation5 + $0x68] sm:$0xff]   ;;  %s1636_s2 = smov 32  }
  0x2a   :  { %1374 = vmatprep.subr.bf16.mxu1 %v1486_v1  ;;  %1355 = vmatpush3.bf16.msra.mxu0 %v1485_v0  ;;  %v1490_v5 = vld [vmem:[#allocation5 + $0x28] sm:$0xff]   ;;  %v1491_v7 = vld [vmem:[#allocation5 + $0x60] sm:$0xff]   ;;  %v1694_v9 = vshrl.u32 %v69_v6, 7  ;;  %v1493_v10 = vld [vmem:[#allocation5 + $0x58] sm:$0xff]  }
  0x2b   :  { %1375 = vmatpush3.bf16.msra.mxu1 %v1486_v1  ;;  %1356 = vmatprep.subr.bf16.mxu0 %v1487_v2  ;;  %v1492_v8 = vld [vmem:[#allocation5 + $0x20] sm:$0xff]   ;;  %v1494_v11 = vld [vmem:[#allocation5 + $0x18] sm:$0xff]   ;;  %v1495_v14 = vld [vmem:[#allocation5 + $0x50] sm:$0xff]  }
  0x2c   :  { %1376 = vmatprep.subr.bf16.mxu1 %v1488_v3  ;;  %v78_v12 = vand.u32 15, %v1694_v9  ;;  %v72_v13 = vadd.s32 16, %v1694_v9  ;;  %v71_v15 = vadd.s32 8, %v1694_v9  ;;  %v1699_v16 = vld [vmem:[#allocation2] sm:$0xff]  ;;  %v131_v17 = vld [vmem:[#allocation2 + $0x8] sm:$0xff]  ;;  %v1701_v18 = vld [vmem:[#allocation2 + $0x18] sm:$0xff] }
  0x2d   :  { %v1496_v19 = vld [vmem:[#allocation5 + $0x10] sm:$0xff]   ;;  %v178_v20 = vpack.c.bf16 %v131_v17, %v1699_v16  ;;  %v134_v22 = vrot.slane %v1699_v16, 7  ;;  %vm138_vm1 = vcmp.lt.s32.totalorder %v1694_v9, 1  ;;  %v1497_v23 = vld [vmem:[#allocation5 + $0x48] sm:$0xff]   ;;  %v135_v24 = vrot.slane %v131_v17, 7  ;;  %v1499_v34 = vld [vmem:[#allocation5 + $0x40] sm:$0xff]  }
  0x2e   :  { %1357 = vmatpush3.bf16.msra.mxu0 %v1487_v2  ;;  %vm1704_vm0 = vcmp.ne.s32.totalorder %v78_v12, 0  ;;  %v137_v25 = vrot.slane %v1701_v18, 7  ;;  %v92_v26 = vand.u32 15, %v72_v13  ;;  %v1498_v27 = vld [vmem:[#allocation5 + $0x8] sm:$0xff]   ;;  %v85_v28 = vand.u32 15, %v71_v15  ;;  %v132_v33 = vld [vmem:[#allocation2 + $0x10] sm:$0xff] }
  0x2f   :  { %1377 = vmatpush3.bf16.msra.mxu1 %v1488_v3  ;;  %1358 = vmatprep.subr.bf16.mxu0 %v1489_v4  ;;  %v141_v29 = vsel %vm138_vm1, %v134_v22, %v135_v24  ;;  %vm1718_vm3 = vmpackc.low %vm1634_vm2, %vm1704_vm0  ;;  %v1500_v35 = vld [vmem:[#allocation5] sm:$0xff]   ;;  %v147_v36 = vrot.slane %v1699_v16, 1  ;;  %v136_v37 = vrot.slane %v132_v33, 7  ;;  %v148_v38 = vrot.slane %v131_v17, 1  ;;  %v1501_v41 = vld [vmem:[#allocation5 + $0xb8] sm:$0xff]  }
  0x30   :  { %1378 = vmatprep.subr.bf16.mxu1 %v1490_v5  ;;  %1370 = vmatprep.mubr.bf16.mxu0 %v178_v20  ;;  %v142_v30 = vsel %vm138_vm1, %v137_v25, %v134_v22  ;;  %vm124_vm4 = vcmp.ne.s32.totalorder %v92_v26, 0  ;;  %vm127_vm5 = vcmp.ne.s32.totalorder %v85_v28, 15  ;;  %v149_v39 = vrot.slane %v132_v33, 1  ;;  %v1502_v48 = vld [vmem:[#allocation5 + $0xb0] sm:$0xff]   ;;  %v1503_v51 = vld [vmem:[#allocation5 + $0xa8] sm:$0xff]   ;;  %v1504_v52 = vld [vmem:[#allocation5 + $0xa0] sm:$0xff]  }
  0x31   :  { %v1239_v32 = vpack.c.bf16 %v141_v29, %v142_v30  ;;  %vm1726_vm6 = vmpackc.low %vm1634_vm2, %vm124_vm4  ;;  %vm151_vm7 = vcmp.lt.s32.totalorder %v1694_v9, 7  ;;  %v139_v43 = vsel %vm138_vm1, %v136_v37, %v137_v25  ;;  %v140_v44 = vsel %vm138_vm1, %v135_v24, %v136_v37  ;;  %v1505_v53 = vld [vmem:[#allocation5 + $0x98] sm:$0xff]   ;;  %v1506_v54 = vld [vmem:[#allocation5 + $0x90] sm:$0xff]  }
  0x32   :  { %1359 = vmatpush3.bf16.msra.mxu0 %v1489_v4  ;;  %vm1732_vm8 = vmpackc.low %vm127_vm5, %vm1634_vm2  ;;  %v153_v45 = vsel %vm151_vm7, %v148_v38, %v149_v39  ;;  %v154_v46 = vsel %vm151_vm7, %v147_v36, %v148_v38  ;;  %v179_v47 = vpack.c.bf16 %v1701_v18, %v132_v33  ;;  %v1242_v49 = vpack.c.bf16 %v139_v43, %v140_v44  ;;  %v1507_v55 = vld [vmem:[#allocation5 + $0x88] sm:$0xff]   ;;  %v1508_v58 = vld [vmem:[#allocation5 + $0x80] sm:$0xff]  }
  0x33   :  { %1379 = vmatpush3.bf16.msra.mxu1 %v1490_v5  ;;  %1360 = vmatprep.subr.bf16.mxu0 %v1491_v7  ;;  %v1253_v50 = vpack.c.bf16 %v153_v45, %v154_v46  ;;  %v73_v56 = vadd.s32 24, %v1694_v9  ;;  %v150_v57 = vrot.slane %v1701_v18, 1  ;;  %v1532_v31 = vld [vmem:[#allocation7 + $0x80] sm:$0xff]  }
  0x34   :  { %1380 = vmatprep.subr.bf16.mxu1 %v1492_v8  ;;  %1390 = vmatprep.mubr.msk.bf16.mxu1 %vm1718_vm3, %v1239_v32 }
  0x35   :  { %v99_v59 = vand.u32 15, %v73_v56  ;;  %v152_v60 = vsel %vm151_vm7, %v149_v39, %v150_v57  ;;  %v155_v61 = vsel %vm151_vm7, %v150_v57, %v147_v36 }
  0x36   :  { %1361 = vmatpush3.bf16.msra.mxu0 %v1491_v7  ;;  %v1256_v62 = vpack.c.bf16 %v155_v61, %v152_v60 }
  0x37   :  { %1381 = vmatpush3.bf16.msra.mxu1 %v1492_v8  ;;  %1362 = vmatprep.subr.bf16.mxu0 %v1493_v10  ;;  %vm129_vm9 = vcmp.ne.s32.totalorder %v99_v59, 15 }
  0x38   :  { %1382 = vmatprep.subr.bf16.mxu1 %v1494_v11  ;;  %vm1756_vm10 = vmpackc.low %vm129_vm9, %vm1634_vm2 }
  0x3a   :  { %1363 = vmatpush3.bf16.msra.mxu0 %v1493_v10 }
  0x3b   :  { %1383 = vmatpush3.bf16.msra.mxu1 %v1494_v11  ;;  %1364 = vmatprep.subr.bf16.mxu0 %v1495_v14 }
  0x3c   :  { %1384 = vmatprep.subr.bf16.mxu1 %v1496_v19 }
  0x3e   :  { %1365 = vmatpush3.bf16.msra.mxu0 %v1495_v14 }
  0x3f   :  { %1385 = vmatpush3.bf16.msra.mxu1 %v1496_v19  ;;  %1366 = vmatprep.subr.bf16.mxu0 %v1497_v23 }
  0x40   :  { %1386 = vmatprep.subr.bf16.mxu1 %v1498_v27 }
  0x42   :  { %1367 = vmatpush3.bf16.msra.mxu0 %v1497_v23 }
  0x43   :  { %1387 = vmatpush3.bf16.msra.mxu1 %v1498_v27  ;;  %1368 = vmatprep.subr.bf16.mxu0 %v1499_v34 }
  0x44   :  { %1388 = vmatprep.subr.bf16.mxu1 %v1500_v35 }
  0x46   :  { %1369 = vmatpush3.bf16.msra.mxu0 %v1499_v34 }
  0x47   :  { %1389 = vmatpush3.bf16.msra.mxu1 %v1500_v35  ;;  %1394 = vmatprep.subr.bf16.mxu0 %v1501_v41 }
  0x49   :  { %1371 = vmatmul.mubr.bf16.vlgmr.msra.gmra.mxu0 %v179_v47 }
  0x4a   :  { %1391 = vmatmul.mubr.msk.bf16.vlgmr.msra.gmra.mxu1 %vm1726_vm6, %v1242_v49  ;;  %1395 = vmatpush3.bf16.msra.mxu0 %v1501_v41 }
  0x4b   :  { %1396 = vmatprep.subr.bf16.mxu0 %v1502_v48  ;;  %1410 = vmatprep.mubr.msk.bf16.mxu0 %vm1732_vm8, %v1253_v50 }
  0x4e   :  { %1397 = vmatpush3.bf16.msra.mxu0 %v1502_v48 }
  0x4f   :  { %1398 = vmatprep.subr.bf16.mxu0 %v1503_v51 }
  0x52   :  { %1399 = vmatpush3.bf16.msra.mxu0 %v1503_v51 }
  0x53   :  { %1400 = vmatprep.subr.bf16.mxu0 %v1504_v52 }
  0x56   :  { %1401 = vmatpush3.bf16.msra.mxu0 %v1504_v52 }
  0x57   :  { %1402 = vmatprep.subr.bf16.mxu0 %v1505_v53 }
  0x5a   :  { %1403 = vmatpush3.bf16.msra.mxu0 %v1505_v53 }
  0x5b   :  { %1404 = vmatprep.subr.bf16.mxu0 %v1506_v54 }
  0x5e   :  { %1405 = vmatpush3.bf16.msra.mxu0 %v1506_v54 }
  0x5f   :  { %1406 = vmatprep.subr.bf16.mxu0 %v1507_v55 }
  0x62   :  { %1407 = vmatpush3.bf16.msra.mxu0 %v1507_v55 }
  0x63   :  { %1408 = vmatprep.subr.bf16.mxu0 %v1508_v58 }
  0x66   :  { %1409 = vmatpush3.bf16.msra.mxu0 %v1508_v58 }
  0x69   :  { %1411 = vmatmul.mubr.msk.bf16.vlgmr.msra.gmra.mxu0 %vm1756_vm10, %v1256_v62 }
 0x109   :  { %v1372_v0 = vpop.f32.mrf.mxu0 }
 0x10a   :  { %v1392_v1 = vpop.f32.mrf.mxu1 }
 0x10b   :  { %v279_v2 = vpop.f32.mrf.mxu0  ;;  %v385_v7 = vadd.f32 %v1392_v1, %v1372_v0 }
 0x10c   :  { %v376_v3 = vpop.f32.mrf.mxu1 }
 0x10d   :  { %v1373_v4 = vpop.f32.mrf.mxu0  ;;  %v377_v10 = vadd.f32 %v376_v3, %v279_v2 }
 0x10e   :  { %v1393_v5 = vpop.f32.mrf.mxu1 }
 0x10f   :  { %v282_v6 = vpop.f32.mrf.mxu0  ;;  %v388_v14 = vadd.f32 %v1393_v5, %v1373_v4 }
 0x110   :  { %v379_v12 = vpop.f32.mrf.mxu1 }
 0x111   :  { %v380_v17 = vadd.f32 %v379_v12, %v282_v6 }
 0x129   :  { %v1412_v8 = vpop.f32.mrf.mxu0 }
 0x12a   :  { %v1762_v11 = vadd.f32 %v1412_v8, %v385_v7 }
 0x12b   :  { %v492_v13 = vpop.f32.mrf.mxu0 }
 0x12c   :  { %v1764_v15 = vadd.f32 %v492_v13, %v377_v10  ;;  %515 = vrot.lane.b32.xlu1 %v1762_v11, %s1632_s12 }
 0x12d   :  { %v1413_v16 = vpop.f32.mrf.mxu0 }
 0x12e   :  { %v1768_v18 = vadd.f32 %v1413_v16, %v388_v14  ;;  %511 = vrot.lane.b32.xlu0 %v1764_v15, %s1632_s12 }
 0x12f   :  { %v495_v19 = vpop.f32.mrf.mxu0 }
 0x130   :  { %v1772_v20 = vadd.f32 %v495_v19, %v380_v17  ;;  %517 = vrot.lane.b32.xlu1 %v1768_v18, %s1632_s12 }
 0x132   :  { %513 = vrot.lane.b32.xlu0 %v1772_v20, %s1632_s12 }
 0x19e   :  { %v516_v21 = vpop.permute.xlu1 %515 }
 0x19f   :  { %v521_v25 = vadd.f32 %v516_v21, %v1762_v11 }
 0x1a0   :  { %v512_v22 = vpop.permute.xlu0 %511 }
 0x1a1   :  { %v519_v23 = vadd.f32 %v512_v22, %v1764_v15 }
 0x1a2   :  { %v518_v27 = vpop.permute.xlu1 %517 }
 0x1a3   :  { %523 = vrot.lane.b32.xlu0 %v519_v23, %s1635_s0  ;;  %v522_v28 = vadd.f32 %v518_v27, %v1768_v18 }
 0x1a4   :  { %v514_v24 = vpop.permute.xlu0 %513 }
 0x1a5   :  { %v520_v26 = vadd.f32 %v514_v24, %v1772_v20 }
 0x1a7   :  { %527 = vrot.lane.b32.xlu0 %v521_v25, %s1635_s0  ;;  %525 = vrot.lane.b32.xlu1 %v520_v26, %s1635_s0 }
 0x1ab   :  { %529 = vrot.lane.b32.xlu1 %v522_v28, %s1635_s0 }
 0x215   :  { %v524_v29 = vpop.permute.xlu0 %523 }
 0x216   :  { %v531_v30 = vadd.f32 %v524_v29, %v519_v23 }
 0x218   :  { %535 = vrot.lane.b32.xlu0 %v531_v30, %s1636_s2 }
 0x219   :  { %v526_v32 = vpop.permute.xlu1 %525  ;;  %v528_v33 = vpop.permute.xlu0 %527 }
 0x21a   :  { %v532_v34 = vadd.f32 %v526_v32, %v520_v26  ;;  %v533_v35 = vadd.f32 %v528_v33, %v521_v25 }
 0x21c   :  { %537 = vrot.lane.b32.xlu1 %v532_v34, %s1636_s2  ;;  %539 = vrot.lane.b32.xlu0 %v533_v35, %s1636_s2 }
 0x21d   :  { %v530_v36 = vpop.permute.xlu1 %529 }
 0x21e   :  { %v534_v37 = vadd.f32 %v530_v36, %v522_v28 }
 0x220   :  { %541 = vrot.lane.b32.xlu1 %v534_v37, %s1636_s2 }
 0x28a   :  { %v536_v38 = vpop.permute.xlu0 %535 }
 0x28b   :  { %v543_v39 = vadd.f32 %v536_v38, %v531_v30 }
 0x28d   :  { %547 = vrot.lane.b32.xlu0 %v543_v39, %s1628_s27 }
 0x28e   :  { %v538_v41 = vpop.permute.xlu1 %537  ;;  %v540_v43 = vpop.permute.xlu0 %539 }
 0x28f   :  { %v544_v44 = vadd.f32 %v538_v41, %v532_v34  ;;  %v545_v45 = vadd.f32 %v540_v43, %v533_v35  ;;  %v1509_v43 = vld [vmem:[#allocation7 + $0x78] sm:$0xff]  }
 0x290   :  { %1414 = vmatprep.subr.bf16.mxu1 %v1509_v43 }
 0x291   :  { %549 = vrot.lane.b32.xlu1 %v544_v44, %s1628_s27  ;;  %551 = vrot.lane.b32.xlu0 %v545_v45, %s1628_s27 }
 0x292   :  { %v542_v46 = vpop.permute.xlu1 %541  ;;  %1415 = vmatpush3.bf16.msra.mxu1 %v1509_v43 }
 0x293   :  { %v546_v47 = vadd.f32 %v542_v46, %v534_v37  ;;  %v1512_v46 = vld [vmem:[#allocation7 + $0x68] sm:$0xff]  }
 0x295   :  { %553 = vrot.lane.b32.xlu1 %v546_v47, %s1628_s27 }
 0x2ff   :  { %v548_v48 = vpop.permute.xlu0 %547 }
 0x300   :  { %v555_v51 = vadd.f32 %v548_v48, %v543_v39  ;;  %v1514_v48 = vld [vmem:[#allocation7 + $0x60] sm:$0xff]  }
 0x303   :  { %v550_v49 = vpop.permute.xlu1 %549  ;;  %v552_v50 = vpop.permute.xlu0 %551 }
 0x304   :  { %v556_v52 = vadd.f32 %v550_v49, %v544_v44  ;;  %v557_v54 = vadd.f32 %v552_v50, %v545_v45  ;;  %v1510_v44 = vld [vmem:[#allocation7 + $0x70] sm:$0xff]   ;;  %v1511_v45 = vld [vmem:[#allocation7 + $0x38] sm:$0xff]   ;;  %v1515_v49 = vld [vmem:[#allocation7 + $0x28] sm:$0xff]  }
 0x305   :  { %1416 = vmatprep.subr.bf16.mxu1 %v1510_v44  ;;  %1434 = vmatprep.subr.bf16.mxu0 %v1511_v45  ;;  %v1516_v50 = vld [vmem:[#allocation7 + $0x58] sm:$0xff]  }
 0x306   :  { %v559_v53 = vadd.f32 %v556_v52, %v555_v51  ;;  %1417 = vmatpush3.bf16.msra.mxu1 %v1510_v44  ;;  %1435 = vmatpush3.bf16.msra.mxu0 %v1511_v45  ;;  %v1517_v51 = vld [vmem:[#allocation7 + $0x20] sm:$0xff]   ;;  %v1518_v52 = vld [vmem:[#allocation7 + $0x50] sm:$0xff]  }
 0x307   :  { %v554_v55 = vpop.permute.xlu1 %553  ;;  %1418 = vmatprep.subr.bf16.mxu1 %v1512_v46 }
 0x308   :  { %v560_v56 = vadd.f32 %v559_v53, %v557_v54  ;;  %v558_v57 = vadd.f32 %v554_v55, %v546_v47  ;;  %v1513_v47 = vld [vmem:[#allocation7 + $0x30] sm:$0xff]   ;;  %v1519_v53 = vld [vmem:[#allocation7 + $0x18] sm:$0xff]   ;;  %v1520_v54 = vld [vmem:[#allocation7 + $0x48] sm:$0xff]  }
 0x309   :  { %1436 = vmatprep.subr.bf16.mxu0 %v1513_v47  ;;  %v1521_v55 = vld [vmem:[#allocation7 + $0x10] sm:$0xff]  }
 0x30a   :  { %v561_v58 = vadd.f32 %v560_v56, %v558_v57  ;;  %1419 = vmatpush3.bf16.msra.mxu1 %v1512_v46  ;;  %1437 = vmatpush3.bf16.msra.mxu0 %v1513_v47  ;;  %v1522_v56 = vld [vmem:[#allocation7 + $0x40] sm:$0xff]   ;;  %v1523_v57 = vld [vmem:[#allocation7 + $0x8] sm:$0xff]  }
 0x30b   :  { %1420 = vmatprep.subr.bf16.mxu1 %v1514_v48  ;;  %1438 = vmatprep.subr.bf16.mxu0 %v1515_v49 }
 0x30c   :  { %v562_v59 = vrot.slane %v561_v58, 4 }
 0x30e   :  { %v563_v60 = vadd.f32 %v562_v59, %v561_v58  ;;  %1421 = vmatpush3.bf16.msra.mxu1 %v1514_v48  ;;  %1439 = vmatpush3.bf16.msra.mxu0 %v1515_v49  ;;  %v1524_v58 = vld [vmem:[#allocation7] sm:$0xff]   ;;  %v1525_v59 = vld [vmem:[#allocation7 + $0xb8] sm:$0xff]  }
 0x30f   :  { %1422 = vmatprep.subr.bf16.mxu1 %v1516_v50  ;;  %1440 = vmatprep.subr.bf16.mxu0 %v1517_v51 }
 0x310   :  { %v564_v61 = vrot.slane %v563_v60, 2 }
 0x312   :  { %v565_v62 = vadd.f32 %v564_v61, %v563_v60  ;;  %1423 = vmatpush3.bf16.msra.mxu1 %v1516_v50  ;;  %1441 = vmatpush3.bf16.msra.mxu0 %v1517_v51  ;;  %v1526_v50 = vld [vmem:[#allocation7 + $0xb0] sm:$0xff]  }
 0x313   :  { %1424 = vmatprep.subr.bf16.mxu1 %v1518_v52  ;;  %1442 = vmatprep.subr.bf16.mxu0 %v1519_v53 }
 0x314   :  { %v566_v0 = vrot.slane %v565_v62, 1 }
 0x316   :  { %v567_v1 = vadd.f32 %v566_v0, %v565_v62  ;;  %1425 = vmatpush3.bf16.msra.mxu1 %v1518_v52  ;;  %1443 = vmatpush3.bf16.msra.mxu0 %v1519_v53 }
 0x317   :  { %1426 = vmatprep.subr.bf16.mxu1 %v1520_v54  ;;  %1444 = vmatprep.subr.bf16.mxu0 %v1521_v55 }
 0x318   :  { %v1794_v2 = vmul.f32 0.001953125, %v567_v1 }
 0x31a   :  { %v570_v3 = vsub.f32 %v1772_v20, %v1794_v2  ;;  %v569_v4 = vsub.f32 %v1764_v15, %v1794_v2  ;;  %v572_v7 = vsub.f32 %v1768_v18, %v1794_v2  ;;  %v571_v8 = vsub.f32 %v1762_v11, %v1794_v2  ;;  %1427 = vmatpush3.bf16.msra.mxu1 %v1520_v54 }
 0x31b   :  { %1445 = vmatpush3.bf16.msra.mxu0 %v1521_v55  ;;  %1428 = vmatprep.subr.bf16.mxu1 %v1522_v56 }
 0x31c   :  { %v574_v5 = vmul.f32 %v570_v3, %v570_v3  ;;  %v573_v6 = vmul.f32 %v569_v4, %v569_v4  ;;  %v576_v10 = vmul.f32 %v572_v7, %v572_v7  ;;  %v575_v12 = vmul.f32 %v571_v8, %v571_v8  ;;  %1446 = vmatprep.subr.bf16.mxu0 %v1523_v57 }
 0x31e   :  { %579 = vrot.lane.b32.xlu1 %v574_v5, %s1632_s12  ;;  %577 = vrot.lane.b32.xlu0 %v573_v6, %s1632_s12 }
 0x31f   :  { %1429 = vmatpush3.bf16.msra.mxu1 %v1522_v56  ;;  %1447 = vmatpush3.bf16.msra.mxu0 %v1523_v57 }
 0x320   :  { %1448 = vmatprep.subr.bf16.mxu0 %v1524_v58  ;;  %1454 = vmatprep.subr.bf16.mxu1 %v1525_v59 }
 0x322   :  { %583 = vrot.lane.b32.xlu1 %v576_v10, %s1632_s12  ;;  %581 = vrot.lane.b32.xlu0 %v575_v12, %s1632_s12 }
 0x323   :  { %1449 = vmatpush3.bf16.msra.mxu0 %v1524_v58 }
 0x390   :  { %v580_v13 = vpop.permute.xlu1 %579  ;;  %v578_v14 = vpop.permute.xlu0 %577 }
 0x391   :  { %v586_v16 = vadd.f32 %v580_v13, %v574_v5  ;;  %v585_v17 = vadd.f32 %v578_v14, %v573_v6 }
 0x393   :  { %591 = vrot.lane.b32.xlu1 %v586_v16, %s1635_s0  ;;  %589 = vrot.lane.b32.xlu0 %v585_v17, %s1635_s0 }
 0x394   :  { %v584_v19 = vpop.permute.xlu1 %583  ;;  %v582_v21 = vpop.permute.xlu0 %581 }
 0x395   :  { %v588_v22 = vadd.f32 %v584_v19, %v576_v10  ;;  %v587_v23 = vadd.f32 %v582_v21, %v575_v12 }
 0x397   :  { %595 = vrot.lane.b32.xlu1 %v588_v22, %s1635_s0  ;;  %593 = vrot.lane.b32.xlu0 %v587_v23, %s1635_s0 }
 0x405   :  { %v592_v24 = vpop.permute.xlu1 %591  ;;  %v590_v25 = vpop.permute.xlu0 %589 }
 0x406   :  { %v598_v26 = vadd.f32 %v592_v24, %v586_v16  ;;  %v597_v27 = vadd.f32 %v590_v25, %v585_v17 }
 0x408   :  { %603 = vrot.lane.b32.xlu1 %v598_v26, %s1636_s2  ;;  %601 = vrot.lane.b32.xlu0 %v597_v27, %s1636_s2 }
 0x409   :  { %v596_v28 = vpop.permute.xlu1 %595  ;;  %v594_v29 = vpop.permute.xlu0 %593 }
 0x40a   :  { %v600_v30 = vadd.f32 %v596_v28, %v588_v22  ;;  %v599_v32 = vadd.f32 %v594_v29, %v587_v23  ;;  %v635_v22 = vld [vmem:[%s1940_s3] sm:$0x1]  ;;  %v1824_v23 = vsub.s32 0, %v1694_v9 }
 0x40c   :  { %607 = vrot.lane.b32.xlu1 %v600_v30, %s1636_s2  ;;  %605 = vrot.lane.b32.xlu0 %v599_v32, %s1636_s2 }
 0x47a   :  { %v604_v33 = vpop.permute.xlu1 %603  ;;  %v602_v34 = vpop.permute.xlu0 %601 }
 0x47b   :  { %v610_v35 = vadd.f32 %v604_v33, %v598_v26  ;;  %v609_v36 = vadd.f32 %v602_v34, %v597_v27  ;;  %v639_v26 = vld [vmem:[%s1941_s4] sm:$0x1] }
 0x47d   :  { %615 = vrot.lane.b32.xlu1 %v610_v35, %s1628_s27  ;;  %613 = vrot.lane.b32.xlu0 %v609_v36, %s1628_s27 }
 0x47e   :  { %v608_v37 = vpop.permute.xlu1 %607  ;;  %v606_v38 = vpop.permute.xlu0 %605 }
 0x47f   :  { %v612_v39 = vadd.f32 %v608_v37, %v600_v30  ;;  %v611_v41 = vadd.f32 %v606_v38, %v599_v32 }
 0x481   :  { %619 = vrot.lane.b32.xlu1 %v612_v39, %s1628_s27  ;;  %617 = vrot.lane.b32.xlu0 %v611_v41, %s1628_s27 }
 0x4ef   :  { %v616_v60 = vpop.permute.xlu1 %615  ;;  %v614_v61 = vpop.permute.xlu0 %613 }
 0x4f0   :  { %v622_v62 = vadd.f32 %v616_v60, %v610_v35  ;;  %v621_v0 = vadd.f32 %v614_v61, %v609_v36  ;;  %v1527_v61 = vld [vmem:[#allocation7 + $0xa8] sm:$0xff]  }
 0x4f2   :  { %v625_v4 = vadd.f32 %v622_v62, %v621_v0  ;;  %v1529_v62 = vld [vmem:[#allocation7 + $0x98] sm:$0xff]   ;;  %v1530_v0 = vld [vmem:[#allocation7 + $0x90] sm:$0xff]  }
 0x4f3   :  { %v620_v1 = vpop.permute.xlu1 %619  ;;  %v618_v3 = vpop.permute.xlu0 %617 }
 0x4f4   :  { %v623_v5 = vadd.f32 %v618_v3, %v611_v41  ;;  %v624_v6 = vadd.f32 %v620_v1, %v612_v39  ;;  %v1531_v1 = vld [vmem:[#allocation7 + $0x88] sm:$0xff]  }
 0x4f6   :  { %v626_v7 = vadd.f32 %v625_v4, %v623_v5 }
 0x4f8   :  { %v627_v8 = vadd.f32 %v626_v7, %v624_v6 }
 0x4fa   :  { %v628_v10 = vrot.slane %v627_v8, 4 }
 0x4fc   :  { %v629_v12 = vadd.f32 %v628_v10, %v627_v8 }
 0x4fe   :  { %v630_v13 = vrot.slane %v629_v12, 2 }
 0x500   :  { %v631_v14 = vadd.f32 %v630_v13, %v629_v12 }
 0x502   :  { %v632_v16 = vrot.slane %v631_v14, 1 }
 0x504   :  { %v633_v17 = vadd.f32 %v632_v16, %v631_v14 }
 0x506   :  { %v634_v19 = vmul.f32 0.001953125, %v633_v17 }
 0x508   :  { %v636_v21 = vadd.f32 1e-05, %v634_v19 }
 0x50a   :  { %1533 = vrsqrt.f32 %v636_v21 }
 0x517   :  { %v1534_v24 = vpop.eup %1533 }
 0x518   :  { %v638_v25 = vmul.f32 %v1534_v24, %v635_v22 }
 0x51a   :  { %v640_v27 = vmul.f32 %v638_v25, %v1794_v2  ;;  %v646_v28 = vrot.slane %v638_v25, %v1824_v23 }
 0x51c   :  { %v641_v29 = vsub.f32 %v639_v26, %v640_v27  ;;  %v648_v30 = vmul.f32 %v646_v28, %v1764_v15  ;;  %v649_v32 = vmul.f32 %v646_v28, %v1772_v20  ;;  %v650_v34 = vmul.f32 %v646_v28, %v1762_v11 }
 0x51d   :  { %v651_v35 = vmul.f32 %v646_v28, %v1768_v18 }
 0x51e   :  { %v656_v33 = vrot.slane %v641_v29, %v1824_v23 }
 0x520   :  { %v658_v36 = vadd.f32 %v656_v33, %v648_v30  ;;  %v659_v37 = vadd.f32 %v656_v33, %v649_v32  ;;  %v660_v38 = vadd.f32 %v656_v33, %v650_v34  ;;  %v661_v39 = vadd.f32 %v656_v33, %v651_v35 }
 0x522   :  { %v662_v41 = vmax.f32 %v658_v36, 0.0  ;;  %v663_v43 = vmax.f32 %v659_v37, 0.0  ;;  %v664_v2 = vmax.f32 %v660_v38, 0.0  ;;  %v665_v44 = vmax.f32 %v661_v39, 0.0 }
 0x524   :  { %v708_v45 = vpack.c.bf16 %v663_v43, %v662_v41  ;;  %v668_v46 = vrot.slane %v664_v2, 7  ;;  %v709_v47 = vpack.c.bf16 %v665_v44, %v664_v2  ;;  %v666_v15 = vrot.slane %v662_v41, 7 }
 0x525   :  { %v667_v48 = vrot.slane %v663_v43, 7  ;;  %v669_v20 = vrot.slane %v665_v44, 7  ;;  %v678_v49 = vrot.slane %v662_v41, 1  ;;  %v679_v11 = vrot.slane %v663_v43, 1 }
 0x526   :  { %1430 = vmatprep.mubr.bf16.mxu1 %v708_v45  ;;  %v680_v51 = vrot.slane %v664_v2, 1  ;;  %v681_v42 = vrot.slane %v665_v44, 1 }
 0x527   :  { %1431 = vmatmul.mubr.bf16.vlgmr.msra.gmra.mxu1 %v709_v47  ;;  %v672_v18 = vsel %vm138_vm1, %v666_v15, %v667_v48  ;;  %v673_v52 = vsel %vm138_vm1, %v669_v20, %v666_v15  ;;  %v670_v53 = vsel %vm138_vm1, %v668_v46, %v669_v20  ;;  %v671_v54 = vsel %vm138_vm1, %v667_v48, %v668_v46 }
 0x528   :  { %1455 = vmatpush3.bf16.msra.mxu1 %v1525_v59  ;;  %v1275_v55 = vpack.c.bf16 %v672_v18, %v673_v52  ;;  %v683_v56 = vsel %vm151_vm7, %v679_v11, %v680_v51  ;;  %v684_v57 = vsel %vm151_vm7, %v678_v49, %v679_v11  ;;  %v1278_v58 = vpack.c.bf16 %v670_v53, %v671_v54  ;;  %v1528_v59 = vld [vmem:[#allocation7 + $0xa0] sm:$0xff]  }
 0x529   :  { %v1289_v60 = vpack.c.bf16 %v683_v56, %v684_v57  ;;  %1456 = vmatprep.subr.bf16.mxu1 %v1526_v50  ;;  %v682_v40 = vsel %vm151_vm7, %v680_v51, %v681_v42  ;;  %v685_v3 = vsel %vm151_vm7, %v681_v42, %v678_v49 }
 0x52a   :  { %1450 = vmatprep.mubr.msk.bf16.mxu0 %vm1718_vm3, %v1275_v55  ;;  %v1292_v4 = vpack.c.bf16 %v685_v3, %v682_v40 }
 0x52b   :  { %1470 = vmatprep.mubr.msk.bf16.mxu1 %vm1732_vm8, %v1289_v60  ;;  %1451 = vmatmul.mubr.msk.bf16.vlgmr.msra.gmra.mxu0 %vm1726_vm6, %v1278_v58 }
 0x52c   :  { %1457 = vmatpush3.bf16.msra.mxu1 %v1526_v50 }
 0x52d   :  { %1458 = vmatprep.subr.bf16.mxu1 %v1527_v61 }
 0x530   :  { %1459 = vmatpush3.bf16.msra.mxu1 %v1527_v61 }
 0x531   :  { %1460 = vmatprep.subr.bf16.mxu1 %v1528_v59 }
 0x534   :  { %1461 = vmatpush3.bf16.msra.mxu1 %v1528_v59 }
 0x535   :  { %1462 = vmatprep.subr.bf16.mxu1 %v1529_v62 }
 0x538   :  { %1463 = vmatpush3.bf16.msra.mxu1 %v1529_v62 }
 0x539   :  { %1464 = vmatprep.subr.bf16.mxu1 %v1530_v0 }
 0x53c   :  { %1465 = vmatpush3.bf16.msra.mxu1 %v1530_v0 }
 0x53d   :  { %1466 = vmatprep.subr.bf16.mxu1 %v1531_v1 }
 0x540   :  { %1467 = vmatpush3.bf16.msra.mxu1 %v1531_v1 }
 0x541   :  { %1468 = vmatprep.subr.bf16.mxu1 %v1532_v31 }
 0x544   :  { %1469 = vmatpush3.bf16.msra.mxu1 %v1532_v31 }
 0x547   :  { %1471 = vmatmul.mubr.msk.bf16.vlgmr.msra.gmra.mxu1 %vm1756_vm10, %v1292_v4 }
 0x5e7   :  { %v1432_v5 = vpop.f32.mrf.mxu1 }
 0x5e9   :  { %v809_v6 = vpop.f32.mrf.mxu1 }
 0x5eb   :  { %v1452_v7 = vpop.f32.mrf.mxu0  ;;  %v1433_v8 = vpop.f32.mrf.mxu1 }
 0x5ec   :  { %v915_v22 = vadd.f32 %v1452_v7, %v1432_v5 }
 0x5ed   :  { %v906_v10 = vpop.f32.mrf.mxu0  ;;  %v812_v12 = vpop.f32.mrf.mxu1 }
 0x5ee   :  { %v907_v16 = vadd.f32 %v906_v10, %v809_v6 }
 0x5ef   :  { %v1453_v13 = vpop.f32.mrf.mxu0 }
 0x5f0   :  { %v918_v27 = vadd.f32 %v1453_v13, %v1433_v8 }
 0x5f1   :  { %v909_v17 = vpop.f32.mrf.mxu0 }
 0x5f2   :  { %v910_v24 = vadd.f32 %v909_v17, %v812_v12 }
 0x607   :  { %v1472_v14 = vpop.f32.mrf.mxu1 }
 0x608   :  { %v1864_v25 = vadd.f32 %v1472_v14, %v915_v22 }
 0x609   :  { %v1022_v19 = vpop.f32.mrf.mxu1 }
 0x60a   :  { %v1860_v21 = vadd.f32 %v1022_v19, %v907_v16 }
 0x60b   :  { %v1473_v9 = vpop.f32.mrf.mxu1 }
 0x60c   :  { %1041 = vrot.lane.b32.xlu0 %v1860_v21, %s1632_s12  ;;  %v1872_v28 = vadd.f32 %v1473_v9, %v918_v27 }
 0x60d   :  { %v1025_v63 = vpop.f32.mrf.mxu1 }
 0x60e   :  { %v1866_v26 = vadd.f32 %v1025_v63, %v910_v24 }
 0x610   :  { %1043 = vrot.lane.b32.xlu1 %v1866_v26, %s1632_s12  ;;  %1045 = vrot.lane.b32.xlu0 %v1864_v25, %s1632_s12 }
 0x614   :  { %1047 = vrot.lane.b32.xlu1 %v1872_v28, %s1632_s12 }
 0x67e   :  { %v1042_v29 = vpop.permute.xlu0 %1041 }
 0x67f   :  { %v1049_v30 = vadd.f32 %v1042_v29, %v1860_v21 }
 0x681   :  { %1053 = vrot.lane.b32.xlu0 %v1049_v30, %s1635_s0 }
 0x682   :  { %v1044_v32 = vpop.permute.xlu1 %1043  ;;  %v1046_v33 = vpop.permute.xlu0 %1045 }
 0x683   :  { %v1050_v34 = vadd.f32 %v1044_v32, %v1866_v26  ;;  %v1051_v35 = vadd.f32 %v1046_v33, %v1864_v25 }
 0x685   :  { %1055 = vrot.lane.b32.xlu1 %v1050_v34, %s1635_s0  ;;  %1057 = vrot.lane.b32.xlu0 %v1051_v35, %s1635_s0 }
 0x686   :  { %v1048_v36 = vpop.permute.xlu1 %1047 }
 0x687   :  { %v1052_v37 = vadd.f32 %v1048_v36, %v1872_v28 }
 0x689   :  { %1059 = vrot.lane.b32.xlu1 %v1052_v37, %s1635_s0 }
 0x6f3   :  { %v1054_v38 = vpop.permute.xlu0 %1053 }
 0x6f4   :  { %v1061_v39 = vadd.f32 %v1054_v38, %v1049_v30 }
 0x6f6   :  { %1065 = vrot.lane.b32.xlu0 %v1061_v39, %s1636_s2 }
 0x6f7   :  { %v1056_v41 = vpop.permute.xlu1 %1055  ;;  %v1058_v43 = vpop.permute.xlu0 %1057 }
 0x6f8   :  { %v1062_v2 = vadd.f32 %v1056_v41, %v1050_v34  ;;  %v1063_v44 = vadd.f32 %v1058_v43, %v1051_v35 }
 0x6fa   :  { %1067 = vrot.lane.b32.xlu1 %v1062_v2, %s1636_s2  ;;  %1069 = vrot.lane.b32.xlu0 %v1063_v44, %s1636_s2 }
 0x6fb   :  { %v1060_v45 = vpop.permute.xlu1 %1059 }
 0x6fc   :  { %v1064_v46 = vadd.f32 %v1060_v45, %v1052_v37 }
 0x6fe   :  { %1071 = vrot.lane.b32.xlu1 %v1064_v46, %s1636_s2 }
 0x768   :  { %v1066_v47 = vpop.permute.xlu0 %1065 }
 0x769   :  { %v1073_v15 = vadd.f32 %v1066_v47, %v1061_v39 }
 0x76b   :  { %1077 = vrot.lane.b32.xlu0 %v1073_v15, %s1628_s27 }
 0x76c   :  { %v1068_v48 = vpop.permute.xlu1 %1067  ;;  %v1070_v20 = vpop.permute.xlu0 %1069 }
 0x76d   :  { %v1074_v49 = vadd.f32 %v1068_v48, %v1062_v2  ;;  %v1075_v50 = vadd.f32 %v1070_v20, %v1063_v44 }
 0x76f   :  { %1079 = vrot.lane.b32.xlu1 %v1074_v49, %s1628_s27  ;;  %1081 = vrot.lane.b32.xlu0 %v1075_v50, %s1628_s27 }
 0x770   :  { %v1072_v11 = vpop.permute.xlu1 %1071 }
 0x771   :  { %v1076_v51 = vadd.f32 %v1072_v11, %v1064_v46 }
 0x773   :  { %1083 = vrot.lane.b32.xlu1 %v1076_v51, %s1628_s27 }
 0x7dd   :  { %v1078_v18 = vpop.permute.xlu0 %1077 }
 0x7de   :  { %v1085_v54 = vadd.f32 %v1078_v18, %v1073_v15 }
 0x7e1   :  { %v1080_v52 = vpop.permute.xlu1 %1079  ;;  %v1082_v53 = vpop.permute.xlu0 %1081 }
 0x7e2   :  { %v1086_v55 = vadd.f32 %v1080_v52, %v1074_v49  ;;  %v1087_v57 = vadd.f32 %v1082_v53, %v1075_v50 }
 0x7e4   :  { %v1089_v56 = vadd.f32 %v1086_v55, %v1085_v54 }
 0x7e5   :  { %v1084_v58 = vpop.permute.xlu1 %1083 }
 0x7e6   :  { %v1090_v60 = vadd.f32 %v1089_v56, %v1087_v57  ;;  %v1088_v61 = vadd.f32 %v1084_v58, %v1076_v51 }
 0x7e8   :  { %v1091_v59 = vadd.f32 %v1090_v60, %v1088_v61 }
 0x7ea   :  { %v1092_v62 = vrot.slane %v1091_v59, 4 }
 0x7ec   :  { %v1093_v0 = vadd.f32 %v1092_v62, %v1091_v59  ;;  %v1165_v59 = vld [vmem:[%s1942_s5] sm:$0x1]  ;;  %s1637_s5 = smov [#allocation8]  }
 0x7ee   :  { %v1094_v1 = vrot.slane %v1093_v0, 2 }
 0x7f0   :  { %v1095_v31 = vadd.f32 %v1094_v1, %v1093_v0  ;;  %v1169_v1 = vld [vmem:[%s1943_s6] sm:$0x1]  ;;  %s1209_s6 = sshll.u32 %s1637_s5, 4  ;;  %s1210_s6 = int_to_ptr.vmem [resolvable:$true] %s1209_s6 }
 0x7f1   :  { %s1601_s25 = scalar_lea.vmem %s1210_s6, 512  ;;  %p1606_p2 = scmp.lt.s32.totalorder %s1210_s6, %s1210_s6 }
 0x7f2   :  { %v1096_v42 = vrot.slane %v1095_v31, 1  ;;  %p1602_p1 = scmp.ne.s32.totalorder %s1210_s6, %s1601_s25  ;;  %p1607_p3 = scmp.lt.s32.totalorder %s1601_s25, %s1601_s25 }
 0x7f4   :  { %v1097_v40 = vadd.f32 %v1096_v42, %v1095_v31  ;;  %p1608_p4 = por %p1607_p3, %p1606_p2 }
 0x7f6   :  { %v1892_v3 = vmul.f32 0.001953125, %v1097_v40  ;;  %p1609_p5 = pnand %p1608_p4, %p1602_p1 }
 0x7f8   :  { %v1100_v4 = vsub.f32 %v1866_v26, %v1892_v3  ;;  %v1099_v5 = vsub.f32 %v1860_v21, %v1892_v3  ;;  %v1102_v8 = vsub.f32 %v1872_v28, %v1892_v3  ;;  %v1101_v10 = vsub.f32 %v1864_v25, %v1892_v3 }
 0x7fa   :  { %v1104_v6 = vmul.f32 %v1100_v4, %v1100_v4  ;;  %v1103_v7 = vmul.f32 %v1099_v5, %v1099_v5  ;;  %v1106_v12 = vmul.f32 %v1102_v8, %v1102_v8  ;;  %v1105_v13 = vmul.f32 %v1101_v10, %v1101_v10 }
 0x7fc   :  { %1109 = vrot.lane.b32.xlu1 %v1104_v6, %s1632_s12  ;;  %1107 = vrot.lane.b32.xlu0 %v1103_v7, %s1632_s12 }
 0x800   :  { %1113 = vrot.lane.b32.xlu1 %v1106_v12, %s1632_s12  ;;  %1111 = vrot.lane.b32.xlu0 %v1105_v13, %s1632_s12 }
 0x86e   :  { %v1110_v14 = vpop.permute.xlu1 %1109  ;;  %v1108_v16 = vpop.permute.xlu0 %1107 }
 0x86f   :  { %v1116_v17 = vadd.f32 %v1110_v14, %v1104_v6  ;;  %v1115_v19 = vadd.f32 %v1108_v16, %v1103_v7 }
 0x871   :  { %1121 = vrot.lane.b32.xlu1 %v1116_v17, %s1635_s0  ;;  %1119 = vrot.lane.b32.xlu0 %v1115_v19, %s1635_s0 }
 0x872   :  { %v1114_v9 = vpop.permute.xlu1 %1113  ;;  %v1112_v22 = vpop.permute.xlu0 %1111 }
 0x873   :  { %v1118_v24 = vadd.f32 %v1114_v9, %v1106_v12  ;;  %v1117_v63 = vadd.f32 %v1112_v22, %v1105_v13  ;;  %v1539_v9 = vld [vmem:[#allocation2 + $0x10] sm:$0xff]  ;;  %v1540_v22 = vld [vmem:[#allocation2 + $0x18] sm:$0xff] }
 0x875   :  { %1125 = vrot.lane.b32.xlu1 %v1118_v24, %s1635_s0  ;;  %1123 = vrot.lane.b32.xlu0 %v1117_v63, %s1635_s0 }
 0x8e3   :  { %v1122_v27 = vpop.permute.xlu1 %1121  ;;  %v1120_v29 = vpop.permute.xlu0 %1119 }
 0x8e4   :  { %v1128_v30 = vadd.f32 %v1122_v27, %v1116_v17  ;;  %v1127_v32 = vadd.f32 %v1120_v29, %v1115_v19  ;;  %v1538_v17 = vld [vmem:[#allocation2 + $0x8] sm:$0xff] }
 0x8e6   :  { %1133 = vrot.lane.b32.xlu1 %v1128_v30, %s1636_s2  ;;  %1131 = vrot.lane.b32.xlu0 %v1127_v32, %s1636_s2 }
 0x8e7   :  { %v1126_v33 = vpop.permute.xlu1 %1125  ;;  %v1124_v34 = vpop.permute.xlu0 %1123 }
 0x8e8   :  { %v1130_v35 = vadd.f32 %v1126_v33, %v1118_v24  ;;  %v1129_v36 = vadd.f32 %v1124_v34, %v1117_v63 }
 0x8ea   :  { %1137 = vrot.lane.b32.xlu1 %v1130_v35, %s1636_s2  ;;  %1135 = vrot.lane.b32.xlu0 %v1129_v36, %s1636_s2 }
 0x958   :  { %v1134_v37 = vpop.permute.xlu1 %1133  ;;  %v1132_v38 = vpop.permute.xlu0 %1131 }
 0x959   :  { %v1140_v39 = vadd.f32 %v1134_v37, %v1128_v30  ;;  %v1139_v41 = vadd.f32 %v1132_v38, %v1127_v32 }
 0x95b   :  { %1145 = vrot.lane.b32.xlu1 %v1140_v39, %s1628_s27  ;;  %1143 = vrot.lane.b32.xlu0 %v1139_v41, %s1628_s27 }
 0x95c   :  { %v1138_v43 = vpop.permute.xlu1 %1137  ;;  %v1136_v2 = vpop.permute.xlu0 %1135 }
 0x95d   :  { %v1142_v44 = vadd.f32 %v1138_v43, %v1130_v35  ;;  %v1141_v45 = vadd.f32 %v1136_v2, %v1129_v36 }
 0x95f   :  { %1149 = vrot.lane.b32.xlu1 %v1142_v44, %s1628_s27  ;;  %1147 = vrot.lane.b32.xlu0 %v1141_v45, %s1628_s27 }
 0x9cd   :  { %v1146_v46 = vpop.permute.xlu1 %1145  ;;  %v1144_v47 = vpop.permute.xlu0 %1143 }
 0x9ce   :  { %v1152_v15 = vadd.f32 %v1146_v46, %v1140_v39  ;;  %v1151_v48 = vadd.f32 %v1144_v47, %v1139_v41 }
 0x9d0   :  { %v1155_v50 = vadd.f32 %v1152_v15, %v1151_v48 }
 0x9d1   :  { %v1150_v20 = vpop.permute.xlu1 %1149  ;;  %v1148_v49 = vpop.permute.xlu0 %1147 }
 0x9d2   :  { %v1153_v11 = vadd.f32 %v1148_v49, %v1141_v45  ;;  %v1154_v51 = vadd.f32 %v1150_v20, %v1142_v44 }
 0x9d4   :  { %v1156_v18 = vadd.f32 %v1155_v50, %v1153_v11 }
 0x9d6   :  { %v1157_v52 = vadd.f32 %v1156_v18, %v1154_v51 }
 0x9d8   :  { %v1158_v53 = vrot.slane %v1157_v52, 4 }
 0x9da   :  { %v1159_v54 = vadd.f32 %v1158_v53, %v1157_v52 }
 0x9dc   :  { %v1160_v55 = vrot.slane %v1159_v54, 2 }
 0x9de   :  { %v1161_v56 = vadd.f32 %v1160_v55, %v1159_v54 }
 0x9e0   :  { %v1162_v57 = vrot.slane %v1161_v56, 1 }
 0x9e2   :  { %v1163_v58 = vadd.f32 %v1162_v57, %v1161_v56 }
 0x9e4   :  { %v1164_v60 = vmul.f32 0.001953125, %v1163_v58 }
 0x9e6   :  { %v1166_v61 = vadd.f32 1e-05, %v1164_v60 }
 0x9e8   :  { %1535 = vrsqrt.f32 %v1166_v61 }
 0x9f5   :  { %v1536_v62 = vpop.eup %1535 }
 0x9f6   :  { %v1168_v0 = vmul.f32 %v1536_v62, %v1165_v59 }
 0x9f8   :  { %v1170_v31 = vmul.f32 %v1168_v0, %v1892_v3  ;;  %v1176_v42 = vrot.slane %v1168_v0, %v1824_v23  ;;  %v1537_v3 = vld [vmem:[#allocation2] sm:$0xff] }
 0x9fa   :  { %v1171_v40 = vsub.f32 %v1169_v1, %v1170_v31  ;;  %v1178_v4 = vmul.f32 %v1176_v42, %v1860_v21  ;;  %v1179_v5 = vmul.f32 %v1176_v42, %v1866_v26  ;;  %v1180_v6 = vmul.f32 %v1176_v42, %v1864_v25 }
 0x9fb   :  { %v1181_v7 = vmul.f32 %v1176_v42, %v1872_v28 }
 0x9fc   :  { %v1186_v8 = vrot.slane %v1171_v40, %v1824_v23 }
 0x9fe   :  { %v1188_v10 = vadd.f32 %v1186_v8, %v1178_v4  ;;  %v1189_v12 = vadd.f32 %v1186_v8, %v1179_v5  ;;  %v1190_v13 = vadd.f32 %v1186_v8, %v1180_v6  ;;  %v1191_v14 = vadd.f32 %v1186_v8, %v1181_v7 }
 0xa00   :  { %v1192_v16 = vadd.f32 %v1537_v3, %v1188_v10  ;;  %v1193_v19 = vadd.f32 %v1538_v17, %v1189_v12  ;;  %v1194_v21 = vadd.f32 %v1539_v9, %v1190_v13  ;;  %v1195_v26 = vadd.f32 %v1540_v22, %v1191_v14 }
 0xa02   :  { %v1196_v24 = vmax.f32 %v1192_v16, 0.0  ;;  %v1197_v25 = vmax.f32 %v1193_v19, 0.0  ;;  %v1198_v63 = vmax.f32 %v1194_v21, 0.0  ;;  %v1199_v28 = vmax.f32 %v1195_v26, 0.0 }
 0xa04   :  { %1200 = vst [vmem:[#allocation8] sm:$0xff] %v1196_v24  ;;  %1201 = vst [vmem:[#allocation8 + $0x8] sm:$0xff] %v1197_v25 }
 0xa05   :  { %1202 = vst [vmem:[#allocation8 + $0x10] sm:$0xff] %v1198_v63  ;;  %1203 = vst [vmem:[#allocation8 + $0x18] sm:$0xff] %v1199_v28 }
 0xa06   :  { %1612 = shalt.err (!%p1609_p5)
}
 0xa07   :  { %1215 = dma.vmem_to_hbm [thread:$0]  %s1210_s6, 512, %s1944_s7, [#allocation4], %s1631_s11, %s1631_s11, %s1632_s12  }
 0xa08   :  { %1625 = dma.done.wait [#allocation4], 512  }
 0xa09   :  { %1626 = vsyncadd [#allocation4], 4294966784 }
 0xa0a   :  { %1219 = vsyncpa [#allocation3], 1 }
 0xa0b   :  { %1220 = vsyncpa [#allocation6], 1 }
 0xa0c   :  { %1221 = vsyncpa [#allocation4], 1 }

</bundles_post_ra>
